<compile_context>
chip_gen: v6e
topology: v6e:2x2x1
jax: 0.10.0
libtpu: 0.0.40
codegen_flags: <defaults>
</compile_context>

<pallas_src>
import jax
import jax.numpy as jnp
from jax.experimental import pallas as pl
from jax.experimental.pallas import tpu as pltpu

HIDDEN = 512
LANE = 128


def _round_up(x, m):
    return -(-x // m) * m


def _fused_heads_kernel(x_ref, w_ref, b_ref, o_ref):
    # Single lane-dense MXU pass: bf16 (TB,512) @ bf16 (512,N_PAD), f32 accumulation,
    # plus the packed f32 (1, N_PAD) bias row broadcast over the batch tile.
    acc = jnp.dot(x_ref[...], w_ref[...], preferred_element_type=jnp.float32)
    o_ref[...] = (acc + b_ref[...]).astype(o_ref.dtype)


def init_params(key, n_colours, n_types, n_seasons, n_genders, hidden=HIDDEN):
    """Deterministic synthetic parameters (PyTorch Linear init, pre-transposed to (in, out))."""
    ks = jax.random.split(key, 10)

    def linear(kw, kb, fan_in, fan_out):
        bound = 1.0 / (fan_in ** 0.5)
        w = jax.random.uniform(kw, (fan_in, fan_out), jnp.float32, -bound, bound)
        b = jax.random.uniform(kb, (1, fan_out), jnp.float32, -bound, bound)
        return w, b

    w_fc, b_fc = linear(ks[0], ks[1], hidden, hidden)
    w_c, b_c = linear(ks[2], ks[3], hidden, n_colours)
    w_t, b_t = linear(ks[4], ks[5], hidden, n_types)
    w_s, b_s = linear(ks[6], ks[7], hidden, n_seasons)
    w_g, b_g = linear(ks[8], ks[9], hidden, n_genders)

    return {
        "w_fc": w_fc, "b_fc": b_fc,
        "w_colour": w_c, "b_colour": b_c,
        "w_type": w_t, "b_type": b_t,
        "w_season": w_s, "b_season": b_s,
        "w_gender": w_g, "b_gender": b_g,
    }


def fold_params(raw, n_colours, n_types, n_seasons, n_genders):
    """Concatenate the 4 heads into one lane-dense weight and fold the fc trunk into it.

    Exact transformation (no activation between fc and the heads in the reference):
        (x @ W_fc + b_fc) @ W_h + b_h == x @ (W_fc @ W_h) + (b_fc @ W_h + b_h)
    The fold is computed in f32; only the final folded weight is cast to bf16 for the
    HBM->VMEM path.  The bias stays f32 (added after the f32-accumulated dot).
    """
    w_heads = jnp.concatenate(
        [raw["w_colour"], raw["w_type"], raw["w_season"], raw["w_gender"]], axis=1)
    b_heads = jnp.concatenate(
        [raw["b_colour"], raw["b_type"], raw["b_season"], raw["b_gender"]], axis=1)

    w_folded = raw["w_fc"] @ w_heads                 # (512, n_total), f32
    b_folded = raw["b_fc"] @ w_heads + b_heads       # (1, n_total),   f32

    n_total = n_colours + n_types + n_seasons + n_genders
    n_pad = max(LANE, _round_up(n_total, LANE))      # pad to full 128-lane width
    w_folded = jnp.pad(w_folded, ((0, 0), (0, n_pad - n_total)))
    b_folded = jnp.pad(b_folded, ((0, 0), (0, n_pad - n_total)))

    splits = {
        "colour": (0, n_colours),
        "product_type": (n_colours, n_types),
        "season": (n_colours + n_types, n_seasons),
        "gender": (n_colours + n_types + n_seasons, n_genders),
    }
    return {
        "w": w_folded.astype(jnp.bfloat16),   # bf16 weight: halves the 256 KiB DMA
        "b": b_folded,                        # f32 bias row (tiny)
        "splits": splits,
        "n_pad": n_pad,
    }


def _pick_batch_tile(B):
    """Choose the batch tile.

    B < 256      -> single full-extent block (zero grid overhead; divisibility rules
                    are satisfied because the block equals the full array dim).
    B >= 256     -> >= 2 grid steps so v7x's two TensorCores both get work; tiles are
                    16-row-aligned (bf16 sublane packing) and capped at 1024 rows
                    (~5 MiB VMEM double-buffered, well under limits on all gens).
    """
    if B < 256:
        return B
    return min(1024, _round_up(pl.cdiv(B, 2), 16))


def multi_output_forward(features, packed):
    """features: (B, 512) backbone output. Returns dict of 4 head logits (f32)."""
    B = features.shape[0]
    n_pad = packed["n_pad"]

    # bf16 HBM->VMEM path for the features (mem-bound kernel); ideally the backbone
    # emits bf16 directly so this cast fuses into its epilogue.
    x = features.astype(jnp.bfloat16)

    tb = _pick_batch_tile(B)
    grid = (pl.cdiv(B, tb),)   # no array padding: Pallas masks the tail block

    bytes_accessed = (
        B * HIDDEN * 2            # bf16 features
        + HIDDEN * n_pad * 2      # bf16 folded weight
        + n_pad * 4               # f32 bias row
        + B * n_pad * 4           # f32 output slab
    )
    cost = pl.CostEstimate(
        flops=2 * B * HIDDEN * n_pad, transcendentals=0, bytes_accessed=bytes_accessed)

    out = pl.pallas_call(
        _fused_heads_kernel,
        out_shape=jax.ShapeDtypeStruct((B, n_pad), jnp.float32),
        grid=grid,
        in_specs=[
            pl.BlockSpec((tb, HIDDEN), lambda i: (i, 0)),      # batch tile of features
            pl.BlockSpec((HIDDEN, n_pad), lambda i: (0, 0)),   # folded weight (invariant -> single DMA)
            pl.BlockSpec((1, n_pad), lambda i: (0, 0)),        # packed bias row (invariant)
        ],
        out_specs=pl.BlockSpec((tb, n_pad), lambda i: (i, 0)),
        compiler_params=pltpu.CompilerParams(
            dimension_semantics=("parallel",)),
        cost_estimate=cost,
    )(x, packed["w"], packed["b"])

    return {
        name: out[:, start:start + size]
        for name, (start, size) in packed["splits"].items()
    }


if __name__ == "__main__":
    key = jax.random.PRNGKey(0)
    k_feat, k_params = jax.random.split(key)

    B = 8
    n_colours, n_types, n_seasons, n_genders = 16, 8, 4, 4

    # Backbone output features (backbone.fc = Identity -> 512-d pooled feature vector).
    features = jax.random.normal(k_feat, (B, HIDDEN), jnp.float32)
    raw = init_params(k_params, n_colours, n_types, n_seasons, n_genders)
    packed = fold_params(raw, n_colours, n_types, n_seasons, n_genders)

    out = multi_output_forward(features, packed)
    out = jax.block_until_ready(out)

    # Correctness check against the exact f32 unfolded path (matches the PyTorch module).
    # Tolerance reflects bf16 storage of features/folded weight (f32 accumulation).
    h = features @ raw["w_fc"] + raw["b_fc"]
    ref = {
        "colour": h @ raw["w_colour"] + raw["b_colour"],
        "product_type": h @ raw["w_type"] + raw["b_type"],
        "season": h @ raw["w_season"] + raw["b_season"],
        "gender": h @ raw["w_gender"] + raw["b_gender"],
    }
    for name in ref:
        assert out[name].shape == ref[name].shape, name
        assert jnp.allclose(out[name], ref[name], atol=3e-2, rtol=3e-2), name

    print("KERNEL_OK")
</pallas_src>

<mosaic_0001>
module attributes {stable_mosaic.version = 11 : i64} {
  func.func @_fused_heads_kernel(%arg0: i32, %arg1: memref<8x512xbf16, #tpu.memory_space<vmem>>, %arg2: memref<512x128xbf16, #tpu.memory_space<vmem>>, %arg3: memref<1x128xf32, #tpu.memory_space<vmem>>, %arg4: memref<8x128xf32, #tpu.memory_space<vmem>>) attributes {dimension_semantics = [#tpu.dimension_semantics<parallel>], iteration_bounds = array<i64: 1>, scalar_prefetch = 0 : i64, scratch_operands = 0 : i64, tpu.core_type = #tpu.core_type<tc>, window_params = [{transform_indices = @transform_0, window_bounds = array<i64: 8, 512>}, {pipeline_mode = #tpu.pipeline_mode<synchronous>, transform_indices = @transform_1, window_bounds = array<i64: 512, 128>}, {pipeline_mode = #tpu.pipeline_mode<synchronous>, transform_indices = @transform_2, window_bounds = array<i64: 1, 128>}, {transform_indices = @transform_3, window_bounds = array<i64: 8, 128>}]} {
    %c0 = arith.constant 0 : index
    %c0_0 = arith.constant 0 : index
    %0 = vector.load %arg1[%c0, %c0_0] : memref<8x512xbf16, #tpu.memory_space<vmem>>, vector<8x512xbf16>
    %c0_1 = arith.constant 0 : index
    %c0_2 = arith.constant 0 : index
    %1 = vector.load %arg2[%c0_1, %c0_2] : memref<512x128xbf16, #tpu.memory_space<vmem>>, vector<512x128xbf16>
    %cst = arith.constant dense<0.000000e+00> : vector<8x128xf32>
    %2 = tpu.matmul %0, %1, %cst {dimension_numbers = #tpu.dot_dimension_numbers<[1], [0], [0], [1], [0, 0, 1, 1], [], []>} : vector<8x512xbf16>, vector<512x128xbf16>, vector<8x128xf32> -> vector<8x128xf32>
    %c0_3 = arith.constant 0 : index
    %c0_4 = arith.constant 0 : index
    %3 = vector.load %arg3[%c0_3, %c0_4] : memref<1x128xf32, #tpu.memory_space<vmem>>, vector<1x128xf32>
    %4 = vector.broadcast %3 : vector<1x128xf32> to vector<8x128xf32>
    %5 = arith.addf %2, %4 : vector<8x128xf32>
    %c0_5 = arith.constant 0 : index
    %c0_6 = arith.constant 0 : index
    %6 = vector.load %arg4[%c0_5, %c0_6] : memref<8x128xf32, #tpu.memory_space<vmem>>, vector<8x128xf32>
    tpu.vector_store %arg4[%c0_5, %c0_6], %5 {strides = array<i32>} : memref<8x128xf32, #tpu.memory_space<vmem>>, vector<8x128xf32>,
    return
  }
  func.func @transform_0(%arg0: i32) -> (i32, i32) {
    %c0_i32 = arith.constant 0 : i32
    %c0_i32_0 = arith.constant 0 : i32
    return %arg0, %c0_i32 : i32, i32
  }
  func.func @transform_1(%arg0: i32) -> (i32, i32) {
    %c0_i32 = arith.constant 0 : i32
    %c0_i32_0 = arith.constant 0 : i32
    %c0_i32_1 = arith.constant 0 : i32
    return %c0_i32, %c0_i32_0 : i32, i32
  }
  func.func @transform_2(%arg0: i32) -> (i32, i32) {
    %c0_i32 = arith.constant 0 : i32
    %c0_i32_0 = arith.constant 0 : i32
    %c0_i32_1 = arith.constant 0 : i32
    return %c0_i32, %c0_i32_0 : i32, i32
  }
  func.func @transform_3(%arg0: i32) -> (i32, i32) {
    %c0_i32 = arith.constant 0 : i32
    %c0_i32_0 = arith.constant 0 : i32
    return %arg0, %c0_i32 : i32, i32
  }
}

</mosaic_0001>

<bundles_post_ra>
// kernel: tpu_custom_call.1
= control target key start
LH: loop header
LB: loop body
LE: loop exit
PB: predicated region body
PF: predicated region fallthrough
CT: control target
= control target key end

     0   :  { %8 = vsyncpa [#allocation3], 0  ;;  %s643_s0 = inlined_call_operand.hbm [shape: bf16[8,512], index: 0, kind: input, shape index: {}]   ;;  %s644_s1 = inlined_call_operand.hbm [shape: bf16[512,128], index: 1, kind: input, shape index: {}]   ;;  %s645_s2 = inlined_call_operand.vmem [shape: f32[1,128], index: 2, kind: input, shape index: {}]   ;;  %s646_s3 = inlined_call_operand.hbm [shape: f32[8,128], index: 3, kind: output, shape index: {}]  }
   0x1   :  { %9 = vsyncpa [#allocation6], 0 }
   0x2   :  { %10 = vsyncpa [#allocation4], 0  ;;  %s606_s12 = smov [#allocation2]   ;;  %s607_s14 = smov [#allocation5]  }
   0x3   :  { %s17_s13 = sshll.u32 %s606_s12, 4  ;;  %s26_s15 = sshll.u32 %s607_s14, 4  ;;  %s18_s13 = int_to_ptr.vmem [resolvable:$true] %s17_s13  ;;  %s27_s15 = int_to_ptr.vmem [resolvable:$true] %s26_s15 }
   0x4   :  { %s548_s16 = scalar_lea.vmem %s18_s13, 256  ;;  %p553_p1 = scmp.lt.s32.totalorder %s18_s13, %s18_s13 }
   0x5   :  { %p549_p0 = scmp.ne.s32.totalorder %s18_s13, %s548_s16  ;;  %p554_p2 = scmp.lt.s32.totalorder %s548_s16, %s548_s16 }
   0x7   :  { %p555_p3 = por %p554_p2, %p553_p1 }
   0x9   :  { %p556_p4 = pnand %p555_p3, %p549_p0 }
   0xb   :  { %559 = shalt.err (!%p556_p4)
}
   0xc   :  { %20 = dma.hbm_to_vmem [thread:$0]  %s643_s0, 256, %s18_s13, [#allocation3]  }
   0xd   :  { %s568_s19 = scalar_lea.vmem %s27_s15, 4096  ;;  %p573_p6 = scmp.lt.s32.totalorder %s27_s15, %s27_s15 }
   0xe   :  { %p569_p5 = scmp.ne.s32.totalorder %s27_s15, %s568_s19  ;;  %p574_p7 = scmp.lt.s32.totalorder %s568_s19, %s568_s19 }
  0x10   :  { %p575_p8 = por %p574_p7, %p573_p6 }
  0x12   :  { %p576_p9 = pnand %p575_p8, %p569_p5 }
  0x14   :  { %579 = shalt.err (!%p576_p9)
}
  0x15   :  { %s608_s20 = smov 64   ;;  %s609_s21 = smov 4  }
  0x16   :  { %32 = dma.hbm_to_vmem [thread:$0]  %s644_s1, 4096, %s27_s15, [#allocation6], %s608_s20, %s608_s20, %s609_s21  }
  0x17   :  { %600 = dma.done.wait [#allocation3], 256  }
  0x18   :  { %601 = vsyncadd [#allocation3], 4294967040 }
  0x19   :  { %602 = dma.done.wait [#allocation6], 4096  }
  0x1a   :  { %603 = vsyncadd [#allocation6], 4294963200  ;;  %v504_v0 = vld [vmem:[#allocation5 + $0x78] sm:$0xff]   ;;  %v508_v4 = vld [vmem:[#allocation5 + $0x70] sm:$0xff]   ;;  %s610_s24 = smov [#allocation7]  }
  0x1b   :  { %v505_v1 = vld [vmem:[#allocation5 + $0xf8] sm:$0xff]   ;;  %455 = vmatprep.subr.bf16.mxu0 %v504_v0  ;;  %v509_v5 = vld [vmem:[#allocation5 + $0xf0] sm:$0xff]   ;;  %v512_v8 = vld [vmem:[#allocation5 + $0x68] sm:$0xff]   ;;  %s408_s25 = sshll.u32 %s610_s24, 4  ;;  %s409_s25 = int_to_ptr.vmem [resolvable:$true] %s408_s25 }
  0x1c   :  { %v506_v2 = vld [vmem:[#allocation5 + $0x38] sm:$0xff]   ;;  %477 = vmatprep.subr.bf16.mxu1 %v505_v1  ;;  %v510_v6 = vld [vmem:[#allocation5 + $0x30] sm:$0xff]   ;;  %v513_v9 = vld [vmem:[#allocation5 + $0xe8] sm:$0xff]   ;;  %s580_s26 = scalar_lea.vmem %s409_s25, 128  ;;  %p585_p11 = scmp.lt.s32.totalorder %s409_s25, %s409_s25 }
  0x1d   :  { %v507_v3 = vld [vmem:[#allocation5 + $0xb8] sm:$0xff]   ;;  %456 = vmatpush3.bf16.msra.mxu0 %v506_v2  ;;  %v511_v7 = vld [vmem:[#allocation5 + $0xb0] sm:$0xff]   ;;  %v514_v10 = vld [vmem:[#allocation5 + $0x28] sm:$0xff]   ;;  %p581_p10 = scmp.ne.s32.totalorder %s409_s25, %s580_s26  ;;  %p586_p12 = scmp.lt.s32.totalorder %s580_s26, %s580_s26 }
  0x1e   :  { %478 = vmatpush3.bf16.msra.mxu1 %v507_v3  ;;  %457 = vmatprep.subr.bf16.mxu0 %v508_v4  ;;  %v515_v11 = vld [vmem:[#allocation5 + $0xa8] sm:$0xff]   ;;  %v516_v12 = vld [vmem:[#allocation5 + $0x60] sm:$0xff]   ;;  %v520_v16 = vld [vmem:[#allocation5 + $0x58] sm:$0xff]  }
  0x1f   :  { %479 = vmatprep.subr.bf16.mxu1 %v509_v5  ;;  %v517_v13 = vld [vmem:[#allocation5 + $0xe0] sm:$0xff]   ;;  %v521_v17 = vld [vmem:[#allocation5 + $0xd8] sm:$0xff]   ;;  %v524_v20 = vld [vmem:[#allocation5 + $0x50] sm:$0xff]   ;;  %p587_p13 = por %p586_p12, %p585_p11 }
  0x20   :  { %v518_v14 = vld [vmem:[#allocation5 + $0x20] sm:$0xff]   ;;  %v522_v18 = vld [vmem:[#allocation5 + $0x18] sm:$0xff]   ;;  %v525_v21 = vld [vmem:[#allocation5 + $0xd0] sm:$0xff]  }
  0x21   :  { %458 = vmatpush3.bf16.msra.mxu0 %v510_v6  ;;  %v519_v15 = vld [vmem:[#allocation5 + $0xa0] sm:$0xff]   ;;  %v523_v19 = vld [vmem:[#allocation5 + $0x98] sm:$0xff]   ;;  %v526_v22 = vld [vmem:[#allocation5 + $0x10] sm:$0xff]   ;;  %p588_p0 = pnand %p587_p13, %p581_p10 }
  0x22   :  { %480 = vmatpush3.bf16.msra.mxu1 %v511_v7  ;;  %459 = vmatprep.subr.bf16.mxu0 %v512_v8  ;;  %v527_v23 = vld [vmem:[#allocation5 + $0x90] sm:$0xff]   ;;  %v528_v24 = vld [vmem:[#allocation5 + $0x48] sm:$0xff]   ;;  %v532_v28 = vld [vmem:[#allocation5 + $0x40] sm:$0xff]  }
  0x23   :  { %481 = vmatprep.subr.bf16.mxu1 %v513_v9  ;;  %v529_v25 = vld [vmem:[#allocation5 + $0xc8] sm:$0xff]   ;;  %v533_v29 = vld [vmem:[#allocation5 + $0xc0] sm:$0xff]   ;;  %v42_v32 = vld [vmem:[#allocation2] sm:$0xff] }
  0x24   :  { %v530_v26 = vld [vmem:[#allocation5 + $0x8] sm:$0xff]   ;;  %v534_v30 = vld [vmem:[#allocation5] sm:$0xff]   ;;  %v43_v33 = vld [vmem:[#allocation2 + $0x8] sm:$0xff]  ;;  %v419_v34 = vcombine.low %v42_v32, %v42_v32  ;;  %v420_v35 = vcombine.high %v42_v32, %v42_v32 }
  0x25   :  { %460 = vmatpush3.bf16.msra.mxu0 %v514_v10  ;;  %v531_v27 = vld [vmem:[#allocation5 + $0x88] sm:$0xff]   ;;  %v535_v31 = vld [vmem:[#allocation5 + $0x80] sm:$0xff]   ;;  %v421_v36 = vcombine.low %v43_v33, %v43_v33  ;;  %v422_v37 = vcombine.high %v43_v33, %v43_v33  ;;  %v418_v40 = vld [vmem:[%s645_s2] ss:$0 sm:$0xff] }
  0x26   :  { %482 = vmatpush3.bf16.msra.mxu1 %v515_v11  ;;  %461 = vmatprep.subr.bf16.mxu0 %v516_v12 }
  0x27   :  { %483 = vmatprep.subr.bf16.mxu1 %v517_v13  ;;  %353 = vmatprep.mubr.bf16.mxu0 %v420_v35 }
  0x28   :  { %393 = vmatprep.mubr.bf16.mxu1 %v422_v37 }
  0x29   :  { %462 = vmatpush3.bf16.msra.mxu0 %v518_v14 }
  0x2a   :  { %484 = vmatpush3.bf16.msra.mxu1 %v519_v15  ;;  %463 = vmatprep.subr.bf16.mxu0 %v520_v16 }
  0x2b   :  { %485 = vmatprep.subr.bf16.mxu1 %v521_v17 }
  0x2d   :  { %464 = vmatpush3.bf16.msra.mxu0 %v522_v18 }
  0x2e   :  { %486 = vmatpush3.bf16.msra.mxu1 %v523_v19  ;;  %465 = vmatprep.subr.bf16.mxu0 %v524_v20 }
  0x2f   :  { %487 = vmatprep.subr.bf16.mxu1 %v525_v21 }
  0x31   :  { %466 = vmatpush3.bf16.msra.mxu0 %v526_v22 }
  0x32   :  { %488 = vmatpush3.bf16.msra.mxu1 %v527_v23  ;;  %467 = vmatprep.subr.bf16.mxu0 %v528_v24 }
  0x33   :  { %489 = vmatprep.subr.bf16.mxu1 %v529_v25 }
  0x35   :  { %468 = vmatpush3.bf16.msra.mxu0 %v530_v26 }
  0x36   :  { %490 = vmatpush3.bf16.msra.mxu1 %v531_v27  ;;  %469 = vmatprep.subr.bf16.mxu0 %v532_v28 }
  0x37   :  { %491 = vmatprep.subr.bf16.mxu1 %v533_v29 }
  0x39   :  { %470 = vmatpush3.bf16.msra.mxu0 %v534_v30 }
  0x3a   :  { %492 = vmatpush3.bf16.msra.mxu1 %v535_v31 }
  0x3c   :  { %354 = vmatmul.mubr.bf16.vlgmr.msra.gmra.mxu0 %v419_v34 }
  0x3d   :  { %394 = vmatmul.mubr.bf16.vlgmr.msra.gmra.mxu1 %v421_v36 }
  0xfc   :  { %v471_v38 = vpop.f32.mrf.mxu0 }
  0xfd   :  { %v493_v39 = vpop.f32.mrf.mxu1 }
  0xfe   :  { %v472_v41 = vpop.f32.mrf.mxu0 }
  0xff   :  { %v494_v42 = vpop.f32.mrf.mxu1  ;;  %v473_v43 = vadd.f32 %v472_v41, %v471_v38 }
 0x100   :  { %v474_v44 = vpop.f32.mrf.mxu0  ;;  %v495_v47 = vadd.f32 %v494_v42, %v493_v39 }
 0x101   :  { %v496_v45 = vpop.f32.mrf.mxu1  ;;  %v356_v46 = vadd.f32 %v473_v43, %v418_v40 }
 0x102   :  { %v475_v48 = vpop.f32.mrf.mxu0 }
 0x103   :  { %v497_v49 = vpop.f32.mrf.mxu1  ;;  %v396_v50 = vadd.f32 %v495_v47, %v356_v46 }
 0x105   :  { %401 = vst [vmem:[#allocation7] sm:$0xff] %v396_v50 }
 0x106   :  { %591 = shalt.err (!%p588_p0)
}
 0x107   :  { %411 = dma.vmem_to_hbm [thread:$0]  %s409_s25, 128, %s646_s3, [#allocation4]  }
 0x108   :  { %604 = dma.done.wait [#allocation4], 128  }
 0x109   :  { %605 = vsyncadd [#allocation4], 4294967168 }
 0x10a   :  { %415 = vsyncpa [#allocation3], 1 }
 0x10b   :  { %416 = vsyncpa [#allocation6], 1 }
 0x10c   :  { %417 = vsyncpa [#allocation4], 1 }

</bundles_post_ra>
